<compile_context>
chip_gen: v7x
topology: tpu7x:2x2x1
jax: 0.10.0
libtpu: 0.0.40
codegen_flags: <defaults>
</compile_context>

<pallas_src>
import functools

import jax
import jax.numpy as jnp
from jax.experimental import pallas as pl
from jax.experimental.pallas import tpu as pltpu

_MIB = 1024 * 1024


def _sdpa_kernel(q_ref, k_ref, v_ref, ctx_ref, attn_ref=None, *, scale, exp_dtype):
    # Block shapes: q (BT, TQ, D), k (BT, Lk, D), v (BT, Lk, Dv)
    q = q_ref[...]
    k = k_ref[...]
    v = v_ref[...]

    # Mirrors PyTorch's `if scale:` truthiness (scale is a Python float at trace time).
    # Folding the scale into q is O(Lq*D) VALU work instead of O(Lq*Lk) on the scores.
    if scale:
        q = q * jnp.asarray(scale, dtype=q.dtype)

    # scores = q @ k^T  (batched, MXU, f32 accumulate)
    s = jnp.einsum("bqd,bkd->bqk", q, k, preferred_element_type=jnp.float32)

    # Numerically-stable softmax over the key axis (torch Softmax(dim=2)).
    m = jnp.max(s, axis=-1, keepdims=True)
    e = jnp.exp((s - m).astype(exp_dtype))          # bf16 exp when inputs are bf16 (v6e/v7x)
    denom = jnp.sum(e.astype(jnp.float32), axis=-1, keepdims=True)
    recip = pl.reciprocal(denom, approx=True)       # (BT, TQ, 1), EUP slot

    # Keep normalization off the MXU critical path: the second matmul depends only on
    # `e`, so the EUP reciprocal and the (TQ, Lk) normalization multiply overlap with
    # it.  The extra ctx scaling is only (TQ, Dv) elements.
    ctx = jnp.einsum("bqk,bkd->bqd", e.astype(v.dtype), v,
                     preferred_element_type=jnp.float32)
    ctx_ref[...] = (ctx * recip).astype(ctx_ref.dtype)

    if attn_ref is not None:
        # Single pass on the largest tensor: keep the multiply in e's dtype.
        attn_ref[...] = (e * recip.astype(e.dtype)).astype(attn_ref.dtype)


def _chip_config():
    """Derive VMEM budget/limit and per-generation knobs from the local chip."""
    try:
        vmem_cap = int(pltpu.get_tpu_info().vmem_capacity_bytes)
    except Exception:
        vmem_cap = 128 * _MIB
    try:
        kind = jax.devices()[0].device_kind.lower()
    except Exception:
        kind = ""
    is_v5 = "v5" in kind
    # v7x-like: 64 MiB VMEM per TensorCore and 2 TensorCores per chip.
    is_v7x_like = ("v7" in kind) or (vmem_cap <= 64 * _MIB)
    return {
        "vmem_budget": int(0.28 * vmem_cap),
        "vmem_limit": int(0.55 * vmem_cap),
        "kv_buffers": 1 if is_v7x_like else 2,
        "split_batch_for_cores": is_v7x_like,
        "bf16_eup": not is_v5,          # v5e has no bf16 EUP/VPU
    }


def _valid_query_tiles(Lq):
    """Query-tile sizes satisfying the (8, 128) sublane constraint (mult of 8 or full)."""
    tiles = {Lq}                        # full extent is always legal
    for d in range(8, Lq, 8):
        if Lq % d == 0:
            tiles.add(d)
    return sorted(tiles)


def _tile_pref(t):
    """MXU-friendly ordering: 256-multiples, then 128-multiples, then plain; bigger wins."""
    if t % 256 == 0:
        cls = 2
    elif t % 128 == 0:
        cls = 1
    else:
        cls = 0
    return (cls, t)


def _choose_tiles(B, Lq, Lk, D, Dv, in_itemsize, attn_itemsize, *,
                  vmem_budget_bytes, kv_buffers, split_batch_for_cores,
                  with_attention, max_tq=512):
    """Pick (bt, tq) so the pipelined working set stays within the VMEM budget."""

    def step_bytes(bt, tq):
        q_ctx = 2 * bt * (tq * D + tq * Dv) * in_itemsize           # double-buffered q/ctx
        kv = kv_buffers * bt * Lk * (D + Dv) * in_itemsize          # K/V resident per bi
        attn = (2 * bt * tq * Lk * attn_itemsize) if with_attention else 0
        inter = 4 * bt * tq * Lk * 4                                # s/e/attn f32 + lo copies
        return q_ctx + kv + attn + inter

    tiles = _valid_query_tiles(Lq)
    capped = [t for t in tiles if t <= max_tq] or [min(tiles)]
    # Lk-aware: among tiles whose single-batch working set fits the budget, take the
    # most MXU-friendly / largest; otherwise fall back to the smallest legal tile.
    fitting = [t for t in capped if step_bytes(1, t) <= vmem_budget_bytes]
    pool = fitting if fitting else [min(tiles)]
    tq = max(pool, key=_tile_pref)

    # Batch packing: amortizes the ~0.35us per-step overhead for tiny shapes.
    bt_limit = B
    if split_batch_for_cores and B > 1:
        bt_limit = max(1, B // 2)       # keep >= 2 batch grid steps for the 2 TensorCores
    bt = 1
    for cand in range(1, min(bt_limit, 256) + 1):
        if B % cand == 0 and step_bytes(cand, tq) <= vmem_budget_bytes:
            bt = cand
    return bt, tq


def scaled_dot_product_attention(q, k, v, scale=None, attn_mask=None,
                                 attention_dropout=0.0, return_attention=True):
    """q: (B, Lq, D), k: (B, Lk, D), v: (B, Lk, Dv) -> (context, attention)."""
    if attn_mask is not None:
        # TODO(synk): attn_mask (masked_fill_) not implemented; guarded instead of faked.
        raise NotImplementedError("attn_mask is not supported by this Pallas kernel")
    if attention_dropout:
        # TODO(synk): dropout p > 0 not implemented; the reference default (0.0) is identity.
        raise NotImplementedError("attention_dropout > 0 is not supported")

    B, Lq, D = q.shape
    Bk, Lk, Dk = k.shape
    Bv, Lkv, Dv = v.shape
    assert Bk == B and Bv == B and Dk == D and Lkv == Lk

    cfg = _chip_config()

    attn_dtype = q.dtype               # bf16 inputs -> bf16 attention write (roofline on v6e)
    in_itemsize = jnp.dtype(q.dtype).itemsize
    attn_itemsize = jnp.dtype(attn_dtype).itemsize
    exp_dtype = (jnp.bfloat16 if (cfg["bf16_eup"] and q.dtype == jnp.bfloat16)
                 else jnp.float32)

    bt, tq = _choose_tiles(
        B, Lq, Lk, D, Dv, in_itemsize, attn_itemsize,
        vmem_budget_bytes=cfg["vmem_budget"],
        kv_buffers=cfg["kv_buffers"],
        split_batch_for_cores=cfg["split_batch_for_cores"],
        with_attention=return_attention,
    )
    grid = (B // bt, Lq // tq)

    kernel = functools.partial(_sdpa_kernel, scale=scale, exp_dtype=exp_dtype)

    bytes_accessed = (B * (Lq * D + Lk * D + Lk * Dv + Lq * Dv) * in_itemsize
                      + (B * Lq * Lk * attn_itemsize if return_attention else 0))
    cost = pl.CostEstimate(
        flops=2 * B * Lq * Lk * (D + Dv),
        transcendentals=B * Lq * Lk,
        bytes_accessed=bytes_accessed,
    )

    kv_kwargs = {}
    if cfg["kv_buffers"] == 1:
        # K/V only change when the batch block changes (once per Lq//tq steps):
        # single-buffer them on VMEM-tight chips (v7x) to free room for bt/tq.
        kv_kwargs = dict(pipeline_mode=pl.Buffered(1))

    in_specs = [
        pl.BlockSpec((bt, tq, D), lambda bi, qi: (bi, qi, 0)),
        pl.BlockSpec((bt, Lk, D), lambda bi, qi: (bi, 0, 0), **kv_kwargs),
        pl.BlockSpec((bt, Lk, Dv), lambda bi, qi: (bi, 0, 0), **kv_kwargs),
    ]
    ctx_spec = pl.BlockSpec((bt, tq, Dv), lambda bi, qi: (bi, qi, 0))

    if return_attention:
        out_shape = (jax.ShapeDtypeStruct((B, Lq, Dv), q.dtype),      # context
                     jax.ShapeDtypeStruct((B, Lq, Lk), attn_dtype))   # attention weights
        out_specs = [ctx_spec,
                     pl.BlockSpec((bt, tq, Lk), lambda bi, qi: (bi, qi, 0))]
    else:
        out_shape = jax.ShapeDtypeStruct((B, Lq, Dv), q.dtype)
        out_specs = ctx_spec

    return pl.pallas_call(
        kernel,
        out_shape=out_shape,
        grid_spec=pltpu.PrefetchScalarGridSpec(
            num_scalar_prefetch=0,
            grid=grid,
            in_specs=in_specs,
            out_specs=out_specs,
        ),
        compiler_params=pltpu.CompilerParams(
            dimension_semantics=("parallel", "parallel"),
            vmem_limit_bytes=cfg["vmem_limit"],
        ),
        cost_estimate=cost,
    )(q, k, v)


def _reference(q, k, v, scale=None):
    s = jnp.einsum("bqd,bkd->bqk", q, k)
    if scale:
        s = s * scale
    attn = jax.nn.softmax(s, axis=2)
    ctx = jnp.einsum("bqk,bkd->bqd", attn, v)
    return ctx, attn


if __name__ == "__main__":
    key = jax.random.PRNGKey(0)
    kq, kk, kv = jax.random.split(key, 3)

    B, Lq, Lk, D, Dv = 2, 8, 8, 32, 32
    q = jax.random.normal(kq, (B, Lq, D), dtype=jnp.float32)
    k = jax.random.normal(kk, (B, Lk, D), dtype=jnp.float32)
    v = jax.random.normal(kv, (B, Lk, Dv), dtype=jnp.float32)
    scale = 1.0 / (D ** 0.5)

    ctx, attn = scaled_dot_product_attention(q, k, v, scale=scale)
    jax.block_until_ready((ctx, attn))

    ctx_ref, attn_ref = _reference(q, k, v, scale=scale)
    # Slightly loose tolerance: the softmax denominator uses the EUP approximate
    # reciprocal (pl.reciprocal(..., approx=True)).
    assert jnp.allclose(ctx, ctx_ref, atol=2e-3, rtol=2e-3), "context mismatch"
    assert jnp.allclose(attn, attn_ref, atol=2e-3, rtol=2e-3), "attention mismatch"

    print("KERNEL_OK")
</pallas_src>

<mosaic_0001>
module attributes {stable_mosaic.version = 11 : i64} {
  func.func @_sdpa_kernel(%arg0: i32, %arg1: i32, %arg2: memref<2x8x32xf32, #tpu.memory_space<vmem>>, %arg3: memref<2x8x32xf32, #tpu.memory_space<vmem>>, %arg4: memref<2x8x32xf32, #tpu.memory_space<vmem>>, %arg5: memref<2x8x32xf32, #tpu.memory_space<vmem>>, %arg6: memref<2x8x8xf32, #tpu.memory_space<vmem>>) attributes {dimension_semantics = [#tpu.dimension_semantics<parallel>, #tpu.dimension_semantics<parallel>], iteration_bounds = array<i64: 1, 1>, scalar_prefetch = 0 : i64, scratch_operands = 0 : i64, tpu.core_type = #tpu.core_type<tc>, window_params = [{transform_indices = @transform_0, window_bounds = array<i64: 2, 8, 32>}, {transform_indices = @transform_1, window_bounds = array<i64: 2, 8, 32>}, {transform_indices = @transform_2, window_bounds = array<i64: 2, 8, 32>}, {transform_indices = @transform_3, window_bounds = array<i64: 2, 8, 32>}, {transform_indices = @transform_4, window_bounds = array<i64: 2, 8, 8>}]} {
    %c0 = arith.constant 0 : index
    %c0_0 = arith.constant 0 : index
    %c0_1 = arith.constant 0 : index
    %0 = vector.load %arg2[%c0, %c0_0, %c0_1] : memref<2x8x32xf32, #tpu.memory_space<vmem>>, vector<2x8x32xf32>
    %c0_2 = arith.constant 0 : index
    %c0_3 = arith.constant 0 : index
    %c0_4 = arith.constant 0 : index
    %1 = vector.load %arg3[%c0_2, %c0_3, %c0_4] : memref<2x8x32xf32, #tpu.memory_space<vmem>>, vector<2x8x32xf32>
    %c0_5 = arith.constant 0 : index
    %c0_6 = arith.constant 0 : index
    %c0_7 = arith.constant 0 : index
    %2 = vector.load %arg4[%c0_5, %c0_6, %c0_7] : memref<2x8x32xf32, #tpu.memory_space<vmem>>, vector<2x8x32xf32>
    %cst = arith.constant 0.176776692 : f32
    %3 = vector.broadcast %cst : f32 to vector<2x8x32xf32>
    %4 = arith.mulf %0, %3 : vector<2x8x32xf32>
    "tpu.trace_start"() <{level = 10 : i32, message = "bqd,bkd->bqk"}> : () -> ()
    %cst_8 = arith.constant dense<0.000000e+00> : vector<2x8x8xf32>
    %5 = tpu.matmul %4, %1, %cst_8 {dimension_numbers = #tpu.dot_dimension_numbers<[2], [2], [1], [1], [0, 0, 0, 1, 1, 1], [0], [0]>} : vector<2x8x32xf32>, vector<2x8x32xf32>, vector<2x8x8xf32> -> vector<2x8x8xf32>
    "tpu.trace_stop"() : () -> ()
    %cst_9 = arith.constant dense<0xFF800000> : vector<2x8xf32>
    %6 = vector.multi_reduction <maximumf>, %5, %cst_9 [2] : vector<2x8x8xf32> to vector<2x8xf32>
    %7 = vector.shape_cast %6 : vector<2x8xf32> to vector<2x8x1xf32>
    %8 = vector.broadcast %7 : vector<2x8x1xf32> to vector<2x8x8xf32>
    %9 = arith.subf %5, %8 : vector<2x8x8xf32>
    %10 = math.exp %9 : vector<2x8x8xf32>
    %cst_10 = arith.constant dense<0.000000e+00> : vector<2x8xf32>
    %11 = vector.multi_reduction <add>, %10, %cst_10 [2] : vector<2x8x8xf32> to vector<2x8xf32>
    %12 = vector.shape_cast %11 : vector<2x8xf32> to vector<2x8x1xf32>
    %13 = tpu.reciprocal %12 {approx = true} : vector<2x8x1xf32> -> vector<2x8x1xf32>
    "tpu.trace_start"() <{level = 10 : i32, message = "bqk,bkd->bqd"}> : () -> ()
    %cst_11 = arith.constant dense<0.000000e+00> : vector<2x8x32xf32>
    %14 = tpu.matmul %10, %2, %cst_11 {dimension_numbers = #tpu.dot_dimension_numbers<[2], [1], [1], [2], [0, 0, 0, 1, 1, 2], [0], [0]>} : vector<2x8x8xf32>, vector<2x8x32xf32>, vector<2x8x32xf32> -> vector<2x8x32xf32>
    "tpu.trace_stop"() : () -> ()
    %15 = vector.broadcast %13 : vector<2x8x1xf32> to vector<2x8x32xf32>
    %16 = arith.mulf %14, %15 : vector<2x8x32xf32>
    %c0_12 = arith.constant 0 : index
    %c0_13 = arith.constant 0 : index
    %c0_14 = arith.constant 0 : index
    %17 = vector.load %arg5[%c0_12, %c0_13, %c0_14] : memref<2x8x32xf32, #tpu.memory_space<vmem>>, vector<2x8x32xf32>
    tpu.vector_store %arg5[%c0_12, %c0_13, %c0_14], %16 {strides = array<i32>} : memref<2x8x32xf32, #tpu.memory_space<vmem>>, vector<2x8x32xf32>,
    %18 = vector.broadcast %13 : vector<2x8x1xf32> to vector<2x8x8xf32>
    %19 = arith.mulf %10, %18 : vector<2x8x8xf32>
    %c0_15 = arith.constant 0 : index
    %c0_16 = arith.constant 0 : index
    %c0_17 = arith.constant 0 : index
    %20 = vector.load %arg6[%c0_15, %c0_16, %c0_17] : memref<2x8x8xf32, #tpu.memory_space<vmem>>, vector<2x8x8xf32>
    tpu.vector_store %arg6[%c0_15, %c0_16, %c0_17], %19 {strides = array<i32>} : memref<2x8x8xf32, #tpu.memory_space<vmem>>, vector<2x8x8xf32>,
    return
  }
  func.func @transform_0(%arg0: i32, %arg1: i32) -> (i32, i32, i32) {
    %c0_i32 = arith.constant 0 : i32
    %c0_i32_0 = arith.constant 0 : i32
    return %arg0, %arg1, %c0_i32 : i32, i32, i32
  }
  func.func @transform_1(%arg0: i32, %arg1: i32) -> (i32, i32, i32) {
    %c0_i32 = arith.constant 0 : i32
    %c0_i32_0 = arith.constant 0 : i32
    %c0_i32_1 = arith.constant 0 : i32
    return %arg0, %c0_i32, %c0_i32_0 : i32, i32, i32
  }
  func.func @transform_2(%arg0: i32, %arg1: i32) -> (i32, i32, i32) {
    %c0_i32 = arith.constant 0 : i32
    %c0_i32_0 = arith.constant 0 : i32
    %c0_i32_1 = arith.constant 0 : i32
    return %arg0, %c0_i32, %c0_i32_0 : i32, i32, i32
  }
  func.func @transform_3(%arg0: i32, %arg1: i32) -> (i32, i32, i32) {
    %c0_i32 = arith.constant 0 : i32
    %c0_i32_0 = arith.constant 0 : i32
    return %arg0, %arg1, %c0_i32 : i32, i32, i32
  }
  func.func @transform_4(%arg0: i32, %arg1: i32) -> (i32, i32, i32) {
    %c0_i32 = arith.constant 0 : i32
    %c0_i32_0 = arith.constant 0 : i32
    return %arg0, %arg1, %c0_i32 : i32, i32, i32
  }
}

</mosaic_0001>

<bundles_post_ra>
// kernel: tpu_custom_call.1
= control target key start
LH: loop header
LB: loop body
LE: loop exit
PB: predicated region body
PF: predicated region fallthrough
CT: control target
= control target key end

     0   :  { %10 = vsyncpa [#allocation3], 0  ;;  %s732_s0 = inlined_call_operand.hbm [shape: f32[2,8,32], index: 0, kind: input, shape index: {}]   ;;  %s733_s1 = inlined_call_operand.hbm [shape: f32[2,8,32], index: 1, kind: input, shape index: {}]   ;;  %s734_s2 = inlined_call_operand.hbm [shape: f32[2,8,32], index: 2, kind: input, shape index: {}]   ;;  %s735_s3 = inlined_call_operand.hbm [shape: f32[2,8,32], index: 3, kind: output, shape index: {0}]   ;;  %s736_s4 = inlined_call_operand.hbm [shape: f32[2,8,8], index: 4, kind: output, shape index: {1}]  }
   0x1   :  { %11 = vsyncpa [#allocation6], 0 }
   0x2   :  { %12 = vsyncpa [#allocation4], 0 }
   0x3   :  { %13 = vsyncpa [#allocation10], 0  ;;  %s598_s15 = smov [#allocation5]   ;;  %s599_s17 = smov [#allocation2]  }
   0x4   :  { %s31_s16 = sshll.u32 %s598_s15, 4  ;;  %s19_s18 = sshll.u32 %s599_s17, 4  ;;  %s32_s16 = int_to_ptr.vmem [resolvable:$true] %s31_s16  ;;  %s632_s18 = int_to_ptr.vmem [resolvable:$true] %s19_s18 }
   0x5   :  { %s480_s21 = scalar_lea.hbm %s733_s1, 256 }
   0x6   :  { %p481_p0 = scmp.ne.s32.totalorder %s733_s1, %s480_s21  ;;  %p484_p1 = scmp.lt.u32.totalorder %s480_s21, %s733_s1 }
   0x8   :  { %p486_p2 = pnand %p484_p1, %p481_p0 }
   0xa   :  { %489 = shalt.err (!%p486_p2)
}
   0xb   :  { %s490_s26 = scalar_lea.vmem %s32_s16, 256  ;;  %p495_p4 = scmp.lt.s32.totalorder %s32_s16, %s32_s16 }
   0xc   :  { %p491_p3 = scmp.ne.s32.totalorder %s32_s16, %s490_s26  ;;  %p496_p5 = scmp.lt.s32.totalorder %s490_s26, %s490_s26 }
   0xe   :  { %p497_p6 = por %p496_p5, %p495_p4 }
  0x10   :  { %p498_p7 = pnand %p497_p6, %p491_p3 }
  0x12   :  { %501 = shalt.err (!%p498_p7)
}
  0x13   :  { %s600_s27 = smov 128   ;;  %s601_s28 = smov 8  }
  0x14   :  { %37 = dma.hbm_to_vmem [thread:$0]  %s733_s1, 256, %s32_s16, [#allocation6], %s600_s27, %s600_s27, %s601_s28  }
  0x15   :  { %s502_s7 = scalar_lea.hbm %s732_s0, 256 }
  0x16   :  { %p503_p8 = scmp.ne.s32.totalorder %s732_s0, %s502_s7  ;;  %p506_p9 = scmp.lt.u32.totalorder %s502_s7, %s732_s0 }
  0x18   :  { %p508_p10 = pnand %p506_p9, %p503_p8 }
  0x1a   :  { %511 = shalt.err (!%p508_p10)
}
  0x1b   :  { %s512_s12 = scalar_lea.vmem %s632_s18, 256  ;;  %p517_p12 = scmp.lt.s32.totalorder %s632_s18, %s632_s18 }
  0x1c   :  { %p513_p11 = scmp.ne.s32.totalorder %s632_s18, %s512_s12  ;;  %p518_p13 = scmp.lt.s32.totalorder %s512_s12, %s512_s12 }
  0x1e   :  { %p519_p0 = por %p518_p13, %p517_p12 }
  0x20   :  { %p520_p1 = pnand %p519_p0, %p513_p11 }
  0x22   :  { %523 = shalt.err (!%p520_p1)
}
  0x23   :  { %25 = dma.hbm_to_vmem [thread:$0]  %s732_s0, 256, %s632_s18, [#allocation3], %s600_s27, %s600_s27, %s601_s28  }
  0x24   :  { %s602_s14 = smov [#allocation7]   ;;  %s524_s19 = scalar_lea.hbm %s734_s2, 256 }
  0x25   :  { %s43_s15 = sshll.u32 %s602_s14, 4  ;;  %p525_p2 = scmp.ne.s32.totalorder %s734_s2, %s524_s19  ;;  %s44_s15 = int_to_ptr.vmem [resolvable:$true] %s43_s15 }
  0x26   :  { %p528_p3 = scmp.lt.u32.totalorder %s524_s19, %s734_s2 }
  0x28   :  { %p530_p4 = pnand %p528_p3, %p525_p2 }
  0x2a   :  { %533 = shalt.err (!%p530_p4)
}
  0x2b   :  { %s534_s24 = scalar_lea.vmem %s44_s15, 256  ;;  %p539_p6 = scmp.lt.s32.totalorder %s44_s15, %s44_s15 }
  0x2c   :  { %p535_p5 = scmp.ne.s32.totalorder %s44_s15, %s534_s24  ;;  %p540_p7 = scmp.lt.s32.totalorder %s534_s24, %s534_s24 }
  0x2e   :  { %p541_p8 = por %p540_p7, %p539_p6 }
  0x30   :  { %p542_p9 = pnand %p541_p8, %p535_p5 }
  0x32   :  { %545 = shalt.err (!%p542_p9)
}
  0x33   :  { %49 = dma.hbm_to_vmem [thread:$0]  %s734_s2, 256, %s44_s15, [#allocation6], %s600_s27, %s600_s27, %s601_s28  }
  0x34   :  { %590 = dma.done.wait [#allocation3], 256  }
  0x35   :  { %591 = vsyncadd [#allocation3], 4294967040 }
  0x36   :  { %592 = dma.done.wait [#allocation6], 512  }
  0x37   :  { %593 = vsyncadd [#allocation6], 4294966784  ;;  %v603_v0 = vmov 0.0   ;;  %vm604_vm0 = vmmov 0   ;;  %vm67_vm1 = vcmask 261120   ;;  %v61_v1 = vld [vmem:[#allocation5] sm:$0xff] }
  0x38   :  { %443 = vmatprep.subr.mxu0 %v603_v0  ;;  %445 = vmatprep.mubr.msk.f32.mxu0 %vm604_vm0, %v603_v0  ;;  %v59_v2 = vld [vmem:[#allocation2] sm:$0xff]  ;;  %v62_v3 = vld [vmem:[#allocation5 + $0x8] sm:$0xff]  ;;  %v60_v5 = vld [vmem:[#allocation2 + $0x8] sm:$0xff]  ;;  %vm220_vm2 = vcmask 64512   ;;  %s605_s2 = smov [#allocation9]  }
  0x39   :  { %448 = vmatprep.subr.mxu1 %v603_v0  ;;  %450 = vmatprep.mubr.msk.f32.mxu1 %vm604_vm0, %v603_v0  ;;  %v65_v4 = vmul.f32 0.17677669, %v59_v2  ;;  %v66_v6 = vmul.f32 0.17677669, %v60_v5  ;;  %v63_v13 = vld [vmem:[#allocation7] sm:$0xff]  ;;  %v64_v14 = vld [vmem:[#allocation7 + $0x8] sm:$0xff] }
  0x3a   :  { %444 = vmatpush3.xpose.msk.msra.mxu0 %vm67_vm1, %v61_v1  ;;  %449 = vmatpush3.xpose.msk.msra.mxu1 %vm67_vm1, %v62_v3  ;;  %s412_s25 = sshll.u32 %s605_s2, 4  ;;  %s413_s25 = int_to_ptr.vmem [resolvable:$true] %s412_s25 }
  0x3b   :  { %453 = vmatprep.subr.mxu0 %v603_v0  ;;  %458 = vmatprep.subr.mxu1 %v603_v0  ;;  %s546_s26 = scalar_lea.vmem %s413_s25, 256  ;;  %p551_p11 = scmp.lt.s32.totalorder %s413_s25, %s413_s25 }
  0x3c   :  { %p547_p10 = scmp.ne.s32.totalorder %s413_s25, %s546_s26  ;;  %p552_p12 = scmp.lt.s32.totalorder %s546_s26, %s546_s26 }
  0x3d   :  { %446 = vmatmul.mubr.msk.f32.vlgmr.msra.gmra.mrb[0].mxu0 %vm67_vm1, %v65_v4  ;;  %451 = vmatmul.mubr.msk.f32.vlgmr.msra.gmra.mrb[0].mxu1 %vm67_vm1, %v66_v6 }
  0x3e   :  { %455 = vmatprep.mubr.msk.f32.mxu0 %vm604_vm0, %v603_v0  ;;  %460 = vmatprep.mubr.msk.f32.mxu1 %vm604_vm0, %v603_v0  ;;  %p553_p13 = por %p552_p12, %p551_p11 }
  0x3f   :  { %454 = vmatpush3.msra.mxu0 %v63_v13  ;;  %459 = vmatpush3.msra.mxu1 %v64_v14 }
  0x40   :  { %p554_p0 = pnand %p553_p13, %p547_p10 }
 0x110   :  { %v140_v7 = vpop.f32.mrb[0].mxu0  ;;  %v216_v8 = vpop.f32.mrb[0].mxu1 }
 0x111   :  { %v447_v9 = vpop.f32.mrb[1].mxu0  ;;  %v221_v10 = vsel %vm220_vm2, %v140_v7, -inf  ;;  %v452_v11 = vpop.f32.mrb[1].mxu1  ;;  %v224_v12 = vsel %vm220_vm2, %v216_v8, -inf }
 0x112   :  { %222 = vmax.xlane.f32.xlu0 %v221_v10 }
 0x116   :  { %225 = vmax.xlane.f32.xlu0 %v224_v12 }
 0x19f   :  { %v223_v15 = vpop.xlane.xlu0 %222 }
 0x1a0   :  { %v227_v16 = vsub.f32 %v140_v7, %v223_v15 }
 0x1a2   :  { %v229_v17 = vmul.f32 1.442695, %v227_v16 }
 0x1a3   :  { %v226_v18 = vpop.xlane.xlu0 %225 }
 0x1a4   :  { %472 = vpow2.f32 %v229_v17  ;;  %v228_v19 = vsub.f32 %v216_v8, %v226_v18 }
 0x1a6   :  { %v231_v20 = vmul.f32 1.442695, %v228_v19 }
 0x1a8   :  { %474 = vpow2.f32 %v231_v20 }
 0x1ae   :  { %v473_v21 = vpop.eup %472 }
 0x1af   :  { %456 = vmatmul.mubr.msk.f32.vlgmr.msra.gmra.mrb[2].mxu0 %vm220_vm2, %v473_v21  ;;  %v233_v22 = vsel %vm220_vm2, %v473_v21, 0.0 }
 0x1b0   :  { %234 = vadd.xlane.f32.xlu1 %v233_v22 }
 0x1b2   :  { %v475_v23 = vpop.eup %474 }
 0x1b3   :  { %461 = vmatmul.mubr.msk.f32.vlgmr.msra.gmra.mrb[2].mxu1 %vm220_vm2, %v475_v23  ;;  %v236_v24 = vsel %vm220_vm2, %v475_v23, 0.0 }
 0x1b4   :  { %237 = vadd.xlane.f32.xlu1 %v236_v24 }
 0x23d   :  { %v235_v25 = vpop.xlane.xlu1 %234 }
 0x23e   :  { %476 = vrcp.f32 %v235_v25 }
 0x241   :  { %v238_v26 = vpop.xlane.xlu1 %237 }
 0x242   :  { %478 = vrcp.f32 %v238_v26 }
 0x248   :  { %v477_v27 = vpop.eup %476 }
 0x249   :  { %v391_v28 = vmul.f32 %v477_v27, %v473_v21 }
 0x24b   :  { %393 = vst.msk [vmem:[#allocation9] sm:$0xff] %vm220_vm2, %v391_v28 }
 0x24c   :  { %v479_v29 = vpop.eup %478 }
 0x24d   :  { %v392_v30 = vmul.f32 %v479_v29, %v475_v23 }
 0x24f   :  { %394 = vst.msk [vmem:[#allocation9 + $0x8] sm:$0xff] %vm220_vm2, %v392_v30 }
 0x250   :  { %557 = shalt.err (!%p554_p0)
}
 0x251   :  { %s558_s5 = scalar_lea.hbm %s736_s4, 256 }
 0x252   :  { %p559_p1 = scmp.ne.s32.totalorder %s736_s4, %s558_s5  ;;  %p562_p2 = scmp.lt.u32.totalorder %s558_s5, %s736_s4 }
 0x254   :  { %p564_p3 = pnand %p562_p2, %p559_p1 }
 0x256   :  { %567 = shalt.err (!%p564_p3)
}
 0x257   :  { %418 = dma.vmem_to_hbm [thread:$0]  %s413_s25, 256, %s736_s4, [#allocation10], %s600_s27, %s600_s27, %s601_s28  }
 0x258   :  { %s606_s12 = smov [#allocation8]  }
 0x259   :  { %s400_s1 = sshll.u32 %s606_s12, 4  ;;  %s401_s1 = int_to_ptr.vmem [resolvable:$true] %s400_s1 }
 0x25a   :  { %s568_s13 = scalar_lea.vmem %s401_s1, 256  ;;  %p573_p5 = scmp.lt.s32.totalorder %s401_s1, %s401_s1 }
 0x25b   :  { %p569_p4 = scmp.ne.s32.totalorder %s401_s1, %s568_s13  ;;  %p574_p6 = scmp.lt.s32.totalorder %s568_s13, %s568_s13 }
 0x25d   :  { %p575_p7 = por %p574_p6, %p573_p5 }
 0x25f   :  { %p576_p8 = pnand %p575_p7, %p569_p4 }
 0x282   :  { %v310_v31 = vpop.f32.mrb[2].mxu0 }
 0x283   :  { %v387_v32 = vmul.f32 %v477_v27, %v310_v31  ;;  %v457_v33 = vpop.f32.mrb[3].mxu0 }
 0x285   :  { %389 = vst.msk [vmem:[#allocation8] sm:$0xff] %vm67_vm1, %v387_v32 }
 0x286   :  { %v383_v34 = vpop.f32.mrb[2].mxu1 }
 0x287   :  { %v388_v35 = vmul.f32 %v479_v29, %v383_v34  ;;  %v462_v36 = vpop.f32.mrb[3].mxu1 }
 0x289   :  { %390 = vst.msk [vmem:[#allocation8 + $0x8] sm:$0xff] %vm67_vm1, %v388_v35 }
 0x28a   :  { %579 = shalt.err (!%p576_p8)
}
 0x28b   :  { %s580_s15 = scalar_lea.hbm %s735_s3, 256 }
 0x28c   :  { %p581_p9 = scmp.ne.s32.totalorder %s735_s3, %s580_s15  ;;  %p584_p10 = scmp.lt.u32.totalorder %s580_s15, %s735_s3 }
 0x28e   :  { %p586_p11 = pnand %p584_p10, %p581_p9 }
 0x290   :  { %589 = shalt.err (!%p586_p11)
}
 0x291   :  { %406 = dma.vmem_to_hbm [thread:$0]  %s401_s1, 256, %s735_s3, [#allocation4], %s600_s27, %s600_s27, %s601_s28  }
 0x292   :  { %594 = dma.done.wait [#allocation4], 256  }
 0x293   :  { %595 = vsyncadd [#allocation4], 4294967040 }
 0x294   :  { %596 = dma.done.wait [#allocation10], 256  }
 0x295   :  { %597 = vsyncadd [#allocation10], 4294967040 }
 0x296   :  { %425 = vsyncpa [#allocation3], 1 }
 0x297   :  { %426 = vsyncpa [#allocation6], 1 }
 0x298   :  { %427 = vsyncpa [#allocation4], 1 }
 0x299   :  { %428 = vsyncpa [#allocation10], 1 }

</bundles_post_ra>
